<compile_context>
chip_gen: v6e
topology: v6e:2x2x1
jax: 0.10.0
libtpu: 0.0.40
codegen_flags: <defaults>
</compile_context>

<pallas_src>
import jax
import jax.numpy as jnp
from jax.experimental import pallas as pl
from jax.experimental.pallas import tpu as pltpu

NUM_AGES = 101   # torch.arange(101)
_TB_MAX = 4096   # max batch rows per tile (keeps VMEM use ~10-15 MiB)


def _round_up(n: int, m: int) -> int:
    return ((n + m - 1) // m) * m


def _prediction_kernel(x_ref, o_ref):
    # x_ref: (tb, C) in the input's native dtype; o_ref: (1, tb) float32
    x = x_ref[...].astype(jnp.float32)                   # (tb, C)
    C = x.shape[1]

    # Numerically-stable softmax pieces along the class axis (torch dim=1).
    m = jnp.max(x, axis=1, keepdims=True)                # (tb, 1) lane reduce
    e = jnp.exp(x - m)                                   # (tb, C), in (0, 1]

    # Reduction weights for the MXU: column 0 = ones (denominator),
    # column 1 = ages 0..100 (numerator).  Both are exact in bf16.
    lane = jax.lax.broadcasted_iota(jnp.int32, (C, 128), 1)
    row = jax.lax.broadcasted_iota(jnp.int32, (C, 128), 0)
    w = jnp.where(lane == 0, 1.0,
                  jnp.where(lane == 1, row.astype(jnp.float32), 0.0)
                  ).astype(jnp.bfloat16)                 # (C, 128)

    # Split e into two exact bf16 pieces so the two MXU passes reproduce the
    # f32 sums to ~2^-17 relative error (a single bf16 pass would lose ~2^-9,
    # which is marginal against the 1e-2/1e-3 tolerance at outputs of O(100)).
    e_hi = e.astype(jnp.bfloat16)
    e_lo = (e - e_hi.astype(jnp.float32)).astype(jnp.bfloat16)
    stats = (jnp.dot(e_hi, w, preferred_element_type=jnp.float32)
             + jnp.dot(e_lo, w, preferred_element_type=jnp.float32))  # (tb,128)

    # Relayout only the tiny per-row stats to batch-on-lanes, then one exact
    # divide per 128 rows (exact: no approx reciprocal — see accuracy fix).
    st = stats[:, :8].T                                  # (8, tb): row0=den, row1=num
    o_ref[...] = st[1:2, :] / st[0:1, :]                 # (1, tb) lane-dense


def _pick_tile(B: int) -> int:
    """Pick the batch-tile size (rows per grid step)."""
    if B <= 1024:
        return _round_up(B, 8)                  # single tile
    # Large batch: big tiles to amortize per-step overhead, but prefer >= 4
    # grid steps (v7x has 2 TensorCores sharded over the "parallel" axis).
    n = -(-B // _TB_MAX)                        # tiles needed at the max size
    n = max(n, min(4, -(-B // 1024)))           # >= 4 tiles once rows allow
    return _round_up(-(-B // n), 128)           # multiple of 128 (lane-dense out)


@jax.jit
def prediction(x: jax.Array) -> jax.Array:
    """x: (B, 101) logits -> (B,) float32 expected age."""
    B, C = x.shape
    assert C == NUM_AGES, f"expected {NUM_AGES} classes, got {C}"

    tb = _pick_tile(B)
    Bp = _round_up(B, tb)
    if Bp != B:
        # Padded rows are zeros (softmax of zeros is well defined); they are
        # sliced away below.
        x = jnp.pad(x, ((0, Bp - B), (0, 0)))
    num_tiles = Bp // tb

    out = pl.pallas_call(
        _prediction_kernel,
        out_shape=jax.ShapeDtypeStruct((1, Bp), jnp.float32),
        grid_spec=pltpu.PrefetchScalarGridSpec(
            num_scalar_prefetch=0,
            grid=(num_tiles,),
            in_specs=[pl.BlockSpec((tb, C), lambda i: (i, 0))],
            out_specs=pl.BlockSpec((1, tb), lambda i: (0, i)),
        ),
        compiler_params=pltpu.CompilerParams(
            dimension_semantics=("parallel",),
            # Headroom for the 4096-row tiles (double-buffered input + f32
            # intermediates); needed mainly on v5e's 16 MiB default.
            vmem_limit_bytes=32 * 1024 * 1024,
        ),
    )(x)
    return out[0, :B]


def _reference(x):
    p = jax.nn.softmax(x.astype(jnp.float32), axis=1)
    ages = jnp.arange(NUM_AGES, dtype=jnp.float32)
    return jnp.sum(p * ages[None, :], axis=1)


if __name__ == "__main__":
    # Small primary test (matches the module's forward semantics).
    key = jax.random.PRNGKey(0)
    B = 8
    x = jax.random.normal(key, (B, NUM_AGES), dtype=jnp.float32)

    out = jax.block_until_ready(prediction(x))
    ref = _reference(x)
    assert out.shape == (B,)
    assert jnp.allclose(out, ref, atol=1e-2, rtol=1e-3), (out, ref)

    # Also exercise the multi-tile grid + padded-tail path.
    B2 = 2600
    x2 = jax.random.normal(jax.random.PRNGKey(1), (B2, NUM_AGES), dtype=jnp.float32)
    out2 = jax.block_until_ready(prediction(x2))
    ref2 = _reference(x2)
    assert out2.shape == (B2,)
    assert jnp.allclose(out2, ref2, atol=1e-2, rtol=1e-3), (out2, ref2)

    print("KERNEL_OK")
</pallas_src>

<mosaic_0001>
module attributes {stable_mosaic.version = 11 : i64} {
  func.func @_prediction_kernel(%arg0: i32, %arg1: memref<8x101xf32, #tpu.memory_space<vmem>>, %arg2: memref<1x8xf32, #tpu.memory_space<vmem>>) attributes {dimension_semantics = [#tpu.dimension_semantics<parallel>], iteration_bounds = array<i64: 1>, scalar_prefetch = 0 : i64, scratch_operands = 0 : i64, tpu.core_type = #tpu.core_type<tc>, window_params = [{transform_indices = @transform_0, window_bounds = array<i64: 8, 101>}, {transform_indices = @transform_1, window_bounds = array<i64: 1, 8>}]} {
    %c0 = arith.constant 0 : index
    %c0_0 = arith.constant 0 : index
    %0 = vector.load %arg1[%c0, %c0_0] : memref<8x101xf32, #tpu.memory_space<vmem>>, vector<8x101xf32>
    %cst = arith.constant dense<0xFF800000> : vector<8xf32>
    %1 = vector.multi_reduction <maximumf>, %0, %cst [1] : vector<8x101xf32> to vector<8xf32>
    %2 = vector.shape_cast %1 : vector<8xf32> to vector<8x1xf32>
    %3 = vector.broadcast %2 : vector<8x1xf32> to vector<8x101xf32>
    %4 = arith.subf %0, %3 : vector<8x101xf32>
    %5 = math.exp %4 : vector<8x101xf32>
    %6 = tpu.iota {dimensions = array<i32: 1>} : vector<101x128xi32>
    %7 = tpu.iota {dimensions = array<i32: 0>} : vector<101x128xi32>
    %c0_i32 = arith.constant 0 : i32
    %8 = vector.broadcast %c0_i32 : i32 to vector<101x128xi32>
    %9 = arith.cmpi eq, %6, %8 : vector<101x128xi32>
    %c1_i32 = arith.constant 1 : i32
    %10 = vector.broadcast %c1_i32 : i32 to vector<101x128xi32>
    %11 = arith.cmpi eq, %6, %10 : vector<101x128xi32>
    %12 = arith.sitofp %7 : vector<101x128xi32> to vector<101x128xf32>
    %cst_1 = arith.constant 0.000000e+00 : f32
    %13 = vector.broadcast %cst_1 : f32 to vector<101x128xf32>
    %14 = arith.select %11, %12, %13 : vector<101x128xi1>, vector<101x128xf32>
    %cst_2 = arith.constant 1.000000e+00 : f32
    %15 = vector.broadcast %cst_2 : f32 to vector<101x128xf32>
    %16 = arith.select %9, %15, %14 : vector<101x128xi1>, vector<101x128xf32>
    %17 = arith.truncf %16 : vector<101x128xf32> to vector<101x128xbf16>
    %18 = arith.truncf %5 : vector<8x101xf32> to vector<8x101xbf16>
    %19 = arith.extf %18 : vector<8x101xbf16> to vector<8x101xf32>
    %20 = arith.subf %5, %19 : vector<8x101xf32>
    %21 = arith.truncf %20 : vector<8x101xf32> to vector<8x101xbf16>
    %cst_3 = arith.constant dense<0.000000e+00> : vector<8x128xf32>
    %22 = tpu.matmul %18, %17, %cst_3 {dimension_numbers = #tpu.dot_dimension_numbers<[1], [0], [0], [1], [0, 0, 1, 1], [], []>} : vector<8x101xbf16>, vector<101x128xbf16>, vector<8x128xf32> -> vector<8x128xf32>
    %cst_4 = arith.constant dense<0.000000e+00> : vector<8x128xf32>
    %23 = tpu.matmul %21, %17, %cst_4 {dimension_numbers = #tpu.dot_dimension_numbers<[1], [0], [0], [1], [0, 0, 1, 1], [], []>} : vector<8x101xbf16>, vector<101x128xbf16>, vector<8x128xf32> -> vector<8x128xf32>
    %24 = arith.addf %22, %23 : vector<8x128xf32>
    %25 = vector.extract_strided_slice %24 {offsets = [0, 0], sizes = [8, 8], strides = [1, 1]} : vector<8x128xf32> to vector<8x8xf32>
    %26 = tpu.transpose %25, [1, 0] : vector<8x8xf32> -> vector<8x8xf32>
    %27 = vector.extract_strided_slice %26 {offsets = [1, 0], sizes = [1, 8], strides = [1, 1]} : vector<8x8xf32> to vector<1x8xf32>
    %28 = vector.extract_strided_slice %26 {offsets = [0, 0], sizes = [1, 8], strides = [1, 1]} : vector<8x8xf32> to vector<1x8xf32>
    %29 = arith.divf %27, %28 : vector<1x8xf32>
    %c0_5 = arith.constant 0 : index
    %c0_6 = arith.constant 0 : index
    %30 = vector.load %arg2[%c0_5, %c0_6] : memref<1x8xf32, #tpu.memory_space<vmem>>, vector<1x8xf32>
    tpu.vector_store %arg2[%c0_5, %c0_6], %29 {strides = array<i32>} : memref<1x8xf32, #tpu.memory_space<vmem>>, vector<1x8xf32>,
    return
  }
  func.func @transform_0(%arg0: i32) -> (i32, i32) {
    %c0_i32 = arith.constant 0 : i32
    %c0_i32_0 = arith.constant 0 : i32
    return %arg0, %c0_i32 : i32, i32
  }
  func.func @transform_1(%arg0: i32) -> (i32, i32) {
    %c0_i32 = arith.constant 0 : i32
    %c0_i32_0 = arith.constant 0 : i32
    return %c0_i32, %arg0 : i32, i32
  }
}

</mosaic_0001>

<bundles_post_ra>
// kernel: prediction.1
= control target key start
LH: loop header
LB: loop body
LE: loop exit
PB: predicated region body
PF: predicated region fallthrough
CT: control target
= control target key end

     0   :  { %6 = vsyncpa [#allocation3], 0  ;;  %s467_s0 = inlined_call_operand.hbm [shape: f32[8,101], index: 0, kind: input, shape index: {}]   ;;  %s468_s1 = inlined_call_operand.hbm [shape: f32[1,8], index: 1, kind: output, shape index: {}]  }
   0x1   :  { %7 = vsyncpa [#allocation4], 0  ;;  %s352_s6 = smov [#allocation2]  }
   0x2   :  { %s14_s7 = sshll.u32 %s352_s6, 4  ;;  %s15_s7 = int_to_ptr.vmem [resolvable:$true] %s14_s7 }
   0x3   :  { %s316_s8 = scalar_lea.vmem %s15_s7, 128  ;;  %p321_p1 = scmp.lt.s32.totalorder %s15_s7, %s15_s7 }
   0x4   :  { %p317_p0 = scmp.ne.s32.totalorder %s15_s7, %s316_s8  ;;  %p322_p2 = scmp.lt.s32.totalorder %s316_s8, %s316_s8 }
   0x6   :  { %p323_p3 = por %p322_p2, %p321_p1 }
   0x8   :  { %p324_p4 = pnand %p323_p3, %p317_p0 }
   0xa   :  { %327 = shalt.err (!%p324_p4)
}
   0xb   :  { %17 = dma.hbm_to_vmem [thread:$0]  %s467_s0, 128, %s15_s7, [#allocation3]  }
   0xc   :  { %348 = dma.done.wait [#allocation3], 128  }
   0xd   :  { %349 = vsyncadd [#allocation3], 4294967168  ;;  %v30_v0 = vlaneseq  ;;  %v353_v1 = vmov 0.0   ;;  %vm101_vm0 = vcmask 1041408   ;;  %vm23_vm1 = vcmask 826368   ;;  %v381_v11 = vld [vmem:[#allocation2] sm:$0xff] }
   0xe   :  { %281 = vmatprep.subr.bf16.mxu1 %v353_v1  ;;  %263 = vmatprep.subr.bf16.mxu0 %v353_v1  ;;  %vm102_vm3 = vcmask 1042432   ;;  %v354_v8 = vmov 65535   ;;  %v24_v13 = vsel %vm23_vm1, %v381_v11, -inf  ;;  %vm355_vm5 = vmmov 0   ;;  %s356_s0 = smov [#allocation5]  }
   0xf   :  { %v372_v2 = vand.u32 127, %v30_v0  ;;  %v374_v3 = vshrl.u32 %v30_v0, 7  ;;  %v103_v9 = vsel %vm101_vm0, 4294967295, %v354_v8  ;;  %25 = vmax.xlane.f32.xlu0 %v24_v13  ;;  %295 = vmatprep.mubr.msk.bf16.mxu1 %vm355_vm5, %v353_v1  ;;  %s236_s11 = sshll.u32 %s356_s0, 4  ;;  %vm228_vm6 = vcmask 58369   ;;  %s237_s11 = int_to_ptr.vmem [resolvable:$true] %s236_s11 }
  0x10   :  { %v104_v17 = vsel %vm102_vm3, %v103_v9, 0  ;;  %277 = vmatprep.mubr.msk.bf16.mxu0 %vm355_vm5, %v353_v1  ;;  %s328_s12 = scalar_lea.vmem %s237_s11, 16  ;;  %s332_s13 = scalar_lea.vmem %s237_s11, 32 }
  0x11   :  { %v45_v4 = vadd.s32 96, %v374_v3  ;;  %v43_v5 = vadd.s32 80, %v374_v3  ;;  %vm47_vm2 = vcmp.eq.s32.totalorder %v372_v2, 1  ;;  %v44_v6 = vadd.s32 88, %v374_v3  ;;  %p329_p5 = scmp.ne.s32.totalorder %s237_s11, %s328_s12  ;;  %p333_p6 = scmp.lt.s32.totalorder %s237_s11, %s237_s11 }
  0x12   :  { %vm46_vm4 = vcmp.eq.s32.totalorder %v372_v2, 0  ;;  %v41_v23 = vadd.s32 64, %v374_v3  ;;  %v42_v24 = vadd.s32 72, %v374_v3  ;;  %v39_v30 = vadd.s32 48, %v374_v3  ;;  %p334_p7 = scmp.lt.s32.totalorder %s332_s13, %s328_s12 }
  0x13   :  { %v60_v7 = vcvt.s32.f32 %v45_v4  ;;  %v58_v10 = vcvt.s32.f32 %v43_v5  ;;  %v59_v12 = vcvt.s32.f32 %v44_v6  ;;  %v40_v31 = vadd.s32 56, %v374_v3 }
  0x14   :  { %v56_v26 = vcvt.s32.f32 %v41_v23  ;;  %v57_v27 = vcvt.s32.f32 %v42_v24  ;;  %v54_v35 = vcvt.s32.f32 %v39_v30  ;;  %v37_v39 = vadd.s32 32, %v374_v3  ;;  %p335_p8 = por %p334_p7, %p333_p6 }
  0x15   :  { %v73_v14 = vsel %vm47_vm2, %v60_v7, 0.0  ;;  %v71_v15 = vsel %vm47_vm2, %v58_v10, 0.0  ;;  %v72_v18 = vsel %vm47_vm2, %v59_v12, 0.0  ;;  %v55_v36 = vcvt.s32.f32 %v40_v31 }
  0x16   :  { %v86_v16 = vsel %vm46_vm4, 1.0, %v73_v14  ;;  %v84_v20 = vsel %vm46_vm4, 1.0, %v71_v15  ;;  %v85_v21 = vsel %vm46_vm4, 1.0, %v72_v18  ;;  %v69_v28 = vsel %vm47_vm2, %v56_v26, 0.0  ;;  %p336_p9 = pnand %p335_p8, %p329_p5 }
  0x17   :  { %v93_v19 = vpack.c.bf16 %v86_v16, %v86_v16  ;;  %v92_v25 = vpack.c.bf16 %v85_v21, %v84_v20  ;;  %v70_v29 = vsel %vm47_vm2, %v57_v27, 0.0  ;;  %v82_v32 = vsel %vm46_vm4, 1.0, %v69_v28 }
  0x18   :  { %v83_v33 = vsel %vm46_vm4, 1.0, %v70_v29  ;;  %v67_v37 = vsel %vm47_vm2, %v54_v35, 0.0  ;;  %v68_v38 = vsel %vm47_vm2, %v55_v36, 0.0  ;;  %v38_v40 = vadd.s32 40, %v374_v3 }
  0x19   :  { %v106_v22 = vand.u32 %v104_v17, %v93_v19  ;;  %v91_v34 = vpack.c.bf16 %v83_v33, %v82_v32  ;;  %v80_v41 = vsel %vm46_vm4, 1.0, %v67_v37  ;;  %v81_v42 = vsel %vm46_vm4, 1.0, %v68_v38 }
  0x1a   :  { %v90_v43 = vpack.c.bf16 %v81_v42, %v80_v41  ;;  %v52_v44 = vcvt.s32.f32 %v37_v39  ;;  %v53_v45 = vcvt.s32.f32 %v38_v40  ;;  %v35_v46 = vadd.s32 16, %v374_v3 }
  0x1b   :  { %282 = vmatpush3.bf16.msra.mxu1 %v106_v22  ;;  %264 = vmatpush3.bf16.msra.mxu0 %v106_v22  ;;  %v36_v47 = vadd.s32 24, %v374_v3  ;;  %v34_v48 = vadd.s32 8, %v374_v3  ;;  %v48_v51 = vcvt.s32.f32 %v374_v3 }
  0x1c   :  { %283 = vmatprep.subr.bf16.mxu1 %v353_v1  ;;  %265 = vmatprep.subr.bf16.mxu0 %v353_v1  ;;  %v65_v49 = vsel %vm47_vm2, %v52_v44, 0.0  ;;  %v66_v50 = vsel %vm47_vm2, %v53_v45, 0.0  ;;  %v50_v54 = vcvt.s32.f32 %v35_v46 }
  0x1d   :  { %v78_v52 = vsel %vm46_vm4, 1.0, %v65_v49  ;;  %v79_v53 = vsel %vm46_vm4, 1.0, %v66_v50  ;;  %v51_v55 = vcvt.s32.f32 %v36_v47  ;;  %v49_v57 = vcvt.s32.f32 %v34_v48 }
  0x1e   :  { %v89_v56 = vpack.c.bf16 %v79_v53, %v78_v52  ;;  %v63_v58 = vsel %vm47_vm2, %v50_v54, 0.0  ;;  %v61_v62 = vsel %vm47_vm2, %v48_v51, 0.0 }
  0x1f   :  { %284 = vmatpush3.bf16.msra.mxu1 %v92_v25  ;;  %266 = vmatpush3.bf16.msra.mxu0 %v92_v25  ;;  %v64_v59 = vsel %vm47_vm2, %v51_v55, 0.0  ;;  %v76_v60 = vsel %vm46_vm4, 1.0, %v63_v58  ;;  %v62_v63 = vsel %vm47_vm2, %v49_v57, 0.0  ;;  %v74_v3 = vsel %vm46_vm4, 1.0, %v61_v62 }
  0x20   :  { %285 = vmatprep.subr.bf16.mxu1 %v353_v1  ;;  %267 = vmatprep.subr.bf16.mxu0 %v353_v1  ;;  %v77_v61 = vsel %vm46_vm4, 1.0, %v64_v59  ;;  %v75_v4 = vsel %vm46_vm4, 1.0, %v62_v63 }
  0x21   :  { %v88_v0 = vpack.c.bf16 %v77_v61, %v76_v60  ;;  %v87_v5 = vpack.c.bf16 %v75_v4, %v74_v3 }
  0x23   :  { %286 = vmatpush3.bf16.msra.mxu1 %v91_v34  ;;  %268 = vmatpush3.bf16.msra.mxu0 %v91_v34 }
  0x24   :  { %287 = vmatprep.subr.bf16.mxu1 %v353_v1  ;;  %269 = vmatprep.subr.bf16.mxu0 %v353_v1 }
  0x27   :  { %288 = vmatpush3.bf16.msra.mxu1 %v90_v43  ;;  %270 = vmatpush3.bf16.msra.mxu0 %v90_v43 }
  0x28   :  { %289 = vmatprep.subr.bf16.mxu1 %v353_v1  ;;  %271 = vmatprep.subr.bf16.mxu0 %v353_v1 }
  0x2b   :  { %290 = vmatpush3.bf16.msra.mxu1 %v89_v56  ;;  %272 = vmatpush3.bf16.msra.mxu0 %v89_v56 }
  0x2c   :  { %291 = vmatprep.subr.bf16.mxu1 %v353_v1  ;;  %273 = vmatprep.subr.bf16.mxu0 %v353_v1 }
  0x2f   :  { %292 = vmatpush3.bf16.msra.mxu1 %v88_v0  ;;  %274 = vmatpush3.bf16.msra.mxu0 %v88_v0 }
  0x30   :  { %293 = vmatprep.subr.bf16.mxu1 %v353_v1  ;;  %275 = vmatprep.subr.bf16.mxu0 %v353_v1 }
  0x33   :  { %294 = vmatpush3.bf16.msra.mxu1 %v87_v5  ;;  %276 = vmatpush3.bf16.msra.mxu0 %v87_v5 }
  0x98   :  { %v26_v6 = vpop.xlane.xlu0 %25 }
  0x99   :  { %v27_v7 = vsub.f32 %v381_v11, %v26_v6 }
  0x9b   :  { %v28_v8 = vmul.f32 1.442695, %v27_v7 }
  0x9d   :  { %304 = vpow2.f32 %v28_v8 }
  0xaa   :  { %v305_v9 = vpop.eup %304 }
  0xab   :  { %v94_v10 = vpack.c.bf16 %v305_v9, %v305_v9 }
  0xad   :  { %v95_v2 = vunpack.c.l.bf16 %v94_v10  ;;  %296 = vmatmul.mubr.msk.bf16.vlgmr.msra.gmra.mxu1 %vm23_vm1, %v94_v10 }
  0xaf   :  { %v96_v12 = vsub.f32 %v305_v9, %v95_v2 }
  0xb1   :  { %v97_v13 = vpack.c.bf16 %v96_v12, %v96_v12 }
  0xb3   :  { %278 = vmatmul.mubr.msk.bf16.vlgmr.msra.gmra.mxu0 %vm23_vm1, %v97_v13 }
 0x16d   :  { %v185_v14 = vpop.f32.mrf.mxu1 }
 0x16f   :  { %v297_v15 = vpop.f32.mrf.mxu1 }
 0x171   :  { %v188_v16 = vpop.f32.mrf.mxu1 }
 0x173   :  { %v142_v1 = vpop.f32.mrf.mxu0  ;;  %v298_v17 = vpop.f32.mrf.mxu1 }
 0x174   :  { %v186_v18 = vadd.f32 %v185_v14, %v142_v1 }
 0x175   :  { %v279_v19 = vpop.f32.mrf.mxu0 }
 0x176   :  { %191 = vxpose.xlu0.b32.start.end [1/1] (short) (narrow) %v186_v18, 8 }
 0x177   :  { %v145_v11 = vpop.f32.mrf.mxu0 }
 0x179   :  { %v280_v20 = vpop.f32.mrf.mxu0 }
 0x1f2   :  { %v207_v21 = vpop.trf.xlu0 }
 0x1f3   :  { %v224_v22 = vrot.slane %v207_v21, 7 }
 0x1f5   :  { %306 = vrcp.f32 %v224_v22 }
 0x202   :  { %v307_v23 = vpop.eup %306 }
 0x203   :  { %v227_v24 = vmul.f32 %v307_v23, %v207_v21 }
 0x205   :  { %229 = vst.msk [vmem:[#allocation5 - $0x1] sm:$0x2] %vm228_vm6, %v227_v24 }
 0x206   :  { %339 = shalt.err (!%p336_p9)
}
 0x207   :  { %239 = dma.vmem_to_hbm [thread:$0]  %s237_s11, 16, %s468_s1, [#allocation4]  }
 0x208   :  { %350 = dma.done.wait [#allocation4], 16  }
 0x209   :  { %351 = vsyncadd [#allocation4], 4294967280 }
 0x20a   :  { %243 = vsyncpa [#allocation3], 1 }
 0x20b   :  { %244 = vsyncpa [#allocation4], 1 }

</bundles_post_ra>
